<compile_context>
chip_gen: v5e
topology: v5e:2x2
jax: 0.10.0
libtpu: 0.0.40
codegen_flags: <defaults>
</compile_context>

<pallas_src>
import jax
import jax.numpy as jnp
from jax.experimental import pallas as pl
from jax.experimental.pallas import tpu as pltpu


def _round_up(x, m):
    return (x + m - 1) // m * m


# ----------------------------- recon loss (MSE) ----------------------------

def _recon_kernel(pred_ref, tgt_ref, part_ref, acc_ref):
    j = pl.program_id(1)

    @pl.when(j == 0)
    def _():
        acc_ref[...] = jnp.zeros_like(acc_ref)

    d = pred_ref[0].astype(jnp.float32) - tgt_ref[0].astype(jnp.float32)
    acc_ref[...] += d * d                      # pure VPU, no per-step reduce

    @pl.when(j == pl.num_programs(1) - 1)
    def _():
        part_ref[...] = jnp.broadcast_to(jnp.sum(acc_ref[...]), part_ref.shape)


def recon_loss(pred, target, *, n_par=2, target_rows=1024):
    """MSE over all elements; pred/target any shape/dtype (cast to f32 in-kernel)."""
    assert pred.shape == target.shape
    n_elems = pred.size

    rows = pl.cdiv(n_elems, 128)
    if rows >= n_par * target_rows:
        tile_rows = target_rows
    else:
        tile_rows = max(8, _round_up(pl.cdiv(rows, n_par), 8))
    tiles_per_par = pl.cdiv(rows, n_par * tile_rows)
    rows_pad = n_par * tiles_per_par * tile_rows
    n_pad = rows_pad * 128

    p = pred.reshape(-1)
    t = target.reshape(-1)
    if n_pad != n_elems:
        # zero padding in BOTH tensors -> diff 0 -> contributes nothing
        p = jnp.pad(p, (0, n_pad - n_elems))
        t = jnp.pad(t, (0, n_pad - n_elems))
    p3 = p.reshape(n_par, tiles_per_par * tile_rows, 128)
    t3 = t.reshape(n_par, tiles_per_par * tile_rows, 128)

    partials = pl.pallas_call(
        _recon_kernel,
        out_shape=jax.ShapeDtypeStruct((n_par, 1, 1), jnp.float32),
        grid_spec=pltpu.PrefetchScalarGridSpec(
            num_scalar_prefetch=0,
            grid=(n_par, tiles_per_par),
            in_specs=[
                pl.BlockSpec((1, tile_rows, 128), lambda i, j: (i, j, 0)),
                pl.BlockSpec((1, tile_rows, 128), lambda i, j: (i, j, 0)),
            ],
            out_specs=pl.BlockSpec((1, 1, 1), lambda i, j: (i, 0, 0)),
            scratch_shapes=[pltpu.VMEM((tile_rows, 128), jnp.float32)],
        ),
        compiler_params=pltpu.CompilerParams(
            dimension_semantics=("parallel", "arbitrary"),
            vmem_limit_bytes=32 * 1024 * 1024,
        ),
    )(p3, t3)
    return jnp.sum(partials) / jnp.float32(n_elems)


# ------------------------ seg loss (softmax cross-entropy) -----------------

def _ce_kernel(logits_ref, labels_ref, part_ref, acc_ref):
    j = pl.program_id(1)

    @pl.when(j == 0)
    def _():
        acc_ref[...] = jnp.zeros_like(acc_ref)

    lg = logits_ref[0].astype(jnp.float32)                 # (C, T) class on sublanes
    lab = labels_ref[0]                                    # (1, T) int32
    m = jnp.max(lg, axis=0, keepdims=True)                 # (1, T)
    lse = m + jnp.log(jnp.sum(jnp.exp(lg - m), axis=0, keepdims=True))
    cls = jax.lax.broadcasted_iota(jnp.int32, lg.shape, 0)  # in-kernel label gather
    tgt = jnp.sum(jnp.where(cls == lab, lg, 0.0), axis=0, keepdims=True)
    valid = lab >= 0                                       # padded points: label = -1
    acc_ref[...] += jnp.where(valid, lse - tgt, 0.0)       # elementwise accumulate

    @pl.when(j == pl.num_programs(1) - 1)
    def _():
        part_ref[...] = jnp.broadcast_to(jnp.sum(acc_ref[...]), part_ref.shape)


def softmax_ce_mean(logits_nchw, labels_nhw, *, lane_cap=8192):
    """Mean softmax CE.  logits: (N,C,H,W), labels: (N,H,W) int."""
    n, c, h, w = logits_nchw.shape
    hw = h * w

    # lane-dense spatial tile: multiple of 128, capped by a ~2 MiB logits tile
    max_lane = max(128, ((2 * 1024 * 1024) // (c * 4)) // 128 * 128)
    tile_hw = min(min(lane_cap, _round_up(hw, 128)), max_lane)
    hw_pad = _round_up(hw, tile_hw)

    lg = logits_nchw.reshape(n, c, hw)                 # contiguous reshape, no copy
    lab = labels_nhw.reshape(n, 1, hw).astype(jnp.int32)
    if hw_pad != hw:
        lg = jnp.pad(lg, ((0, 0), (0, 0), (0, hw_pad - hw)))
        lab = jnp.pad(lab, ((0, 0), (0, 0), (0, hw_pad - hw)), constant_values=-1)

    partials = pl.pallas_call(
        _ce_kernel,
        out_shape=jax.ShapeDtypeStruct((n, 1, 1), jnp.float32),
        grid_spec=pltpu.PrefetchScalarGridSpec(
            num_scalar_prefetch=0,
            grid=(n, hw_pad // tile_hw),
            in_specs=[
                pl.BlockSpec((1, c, tile_hw), lambda i, j: (i, 0, j)),
                pl.BlockSpec((1, 1, tile_hw), lambda i, j: (i, 0, j)),
            ],
            out_specs=pl.BlockSpec((1, 1, 1), lambda i, j: (i, 0, 0)),
            scratch_shapes=[pltpu.VMEM((1, tile_hw), jnp.float32)],
        ),
        compiler_params=pltpu.CompilerParams(
            dimension_semantics=("parallel", "arbitrary"),
            vmem_limit_bytes=32 * 1024 * 1024,
        ),
    )(lg, lab)
    return jnp.sum(partials) / jnp.float32(n * hw)


def seg_loss(segm, ds_scales):
    """segm: list of (logits NCHW, labels NHW int) per deep-supervision scale."""
    total = jnp.float32(0.0)
    for (logits, labels), wgt in zip(segm, ds_scales):
        total = total + jnp.float32(wgt) * softmax_ce_mean(logits, labels)
    return total


# --------------------------------- NetLoss ---------------------------------

def net_loss(recon, segm, ds_scales):
    r_loss = recon_loss(*recon)
    s_loss = seg_loss(segm, ds_scales)
    return (r_loss + s_loss, r_loss, s_loss)


# ----------------------------- pure-JAX reference --------------------------

def _net_loss_ref(recon, segm, ds_scales):
    pred, tgt = recon
    r = jnp.mean((pred.astype(jnp.float32) - tgt.astype(jnp.float32)) ** 2)
    s = jnp.float32(0.0)
    for (logits, labels), wgt in zip(segm, ds_scales):
        n, c, h, w = logits.shape
        lp = jnp.transpose(logits, (0, 2, 3, 1)).reshape(-1, c).astype(jnp.float32)
        lse = jax.scipy.special.logsumexp(lp, axis=-1)
        picked = jnp.take_along_axis(lp, labels.reshape(-1, 1), axis=-1)[:, 0]
        s = s + jnp.float32(wgt) * jnp.mean(lse - picked)
    return (r + s, r, s)


if __name__ == "__main__":
    key = jax.random.PRNGKey(0)
    k1, k2, k3, k4, k5, k6 = jax.random.split(key, 6)

    ds_scales = (1.0, 0.5)

    # recon pair: N=2, C=4, H=W=16 (NCHW)
    recon_pred = jax.random.normal(k1, (2, 4, 16, 16), dtype=jnp.float32)
    recon_tgt = jax.random.normal(k2, (2, 4, 16, 16), dtype=jnp.float32)

    # segmentation: 4 classes, two deep-supervision scales (16x16 and 8x8)
    seg_logits_0 = jax.random.normal(k3, (2, 4, 16, 16), dtype=jnp.float32)
    seg_labels_0 = jax.random.randint(k4, (2, 16, 16), 0, 4, dtype=jnp.int32)
    seg_logits_1 = jax.random.normal(k5, (2, 4, 8, 8), dtype=jnp.float32)
    seg_labels_1 = jax.random.randint(k6, (2, 8, 8), 0, 4, dtype=jnp.int32)

    recon = (recon_pred, recon_tgt)
    segm = [(seg_logits_0, seg_labels_0), (seg_logits_1, seg_labels_1)]

    total, r_loss, s_loss = net_loss(recon, segm, ds_scales)
    jax.block_until_ready((total, r_loss, s_loss))

    ref_total, ref_r, ref_s = _net_loss_ref(recon, segm, ds_scales)
    assert jnp.allclose(r_loss, ref_r, rtol=1e-5, atol=1e-5)
    assert jnp.allclose(s_loss, ref_s, rtol=1e-5, atol=1e-5)
    assert jnp.allclose(total, ref_total, rtol=1e-5, atol=1e-5)

    print("KERNEL_OK")
</pallas_src>

<mosaic_0001>
module attributes {stable_mosaic.version = 11 : i64} {
  func.func @_recon_kernel(%arg0: i32, %arg1: i32, %arg2: memref<1x8x128xf32, #tpu.memory_space<vmem>>, %arg3: memref<1x8x128xf32, #tpu.memory_space<vmem>>, %arg4: memref<1x1x1xf32, #tpu.memory_space<vmem>>, %arg5: memref<8x128xf32, #tpu.memory_space<vmem>>) attributes {dimension_semantics = [#tpu.dimension_semantics<parallel>, #tpu.dimension_semantics<arbitrary>], iteration_bounds = array<i64: 2, 1>, scalar_prefetch = 0 : i64, scratch_operands = 1 : i64, tpu.core_type = #tpu.core_type<tc>, window_params = [{transform_indices = @transform_0, window_bounds = array<i64: 1, 8, 128>}, {transform_indices = @transform_1, window_bounds = array<i64: 1, 8, 128>}, {transform_indices = @transform_2, window_bounds = array<i64: 1, 1, 1>}]} {
    %c0_i32 = arith.constant 0 : i32
    %0 = arith.cmpi eq, %arg1, %c0_i32 : i32
    %1 = arith.extui %0 : i1 to i32
    %c0_i32_0 = arith.constant 0 : i32
    %2 = arith.cmpi ne, %1, %c0_i32_0 : i32
    scf.if %2 {
      %cst = arith.constant 0.000000e+00 : f32
      %15 = vector.broadcast %cst : f32 to vector<8x128xf32>
      %c0_12 = arith.constant 0 : index
      %c0_13 = arith.constant 0 : index
      %16 = vector.load %arg5[%c0_12, %c0_13] : memref<8x128xf32, #tpu.memory_space<vmem>>, vector<8x128xf32>
      tpu.vector_store %arg5[%c0_12, %c0_13], %15 {strides = array<i32>} : memref<8x128xf32, #tpu.memory_space<vmem>>, vector<8x128xf32>,
    } else {
    }
    %c0 = arith.constant 0 : index
    %c0_1 = arith.constant 0 : index
    %c0_2 = arith.constant 0 : index
    %3 = vector.load %arg2[%c0, %c0_1, %c0_2] : memref<1x8x128xf32, #tpu.memory_space<vmem>>, vector<1x8x128xf32>
    %4 = vector.shape_cast %3 : vector<1x8x128xf32> to vector<8x128xf32>
    %c0_3 = arith.constant 0 : index
    %c0_4 = arith.constant 0 : index
    %c0_5 = arith.constant 0 : index
    %5 = vector.load %arg3[%c0_3, %c0_4, %c0_5] : memref<1x8x128xf32, #tpu.memory_space<vmem>>, vector<1x8x128xf32>
    %6 = vector.shape_cast %5 : vector<1x8x128xf32> to vector<8x128xf32>
    %7 = arith.subf %4, %6 : vector<8x128xf32>
    %c0_6 = arith.constant 0 : index
    %c0_7 = arith.constant 0 : index
    %8 = vector.load %arg5[%c0_6, %c0_7] : memref<8x128xf32, #tpu.memory_space<vmem>>, vector<8x128xf32>
    %9 = arith.mulf %7, %7 : vector<8x128xf32>
    %10 = arith.addf %8, %9 : vector<8x128xf32>
    %c0_8 = arith.constant 0 : index
    %c0_9 = arith.constant 0 : index
    %11 = vector.load %arg5[%c0_8, %c0_9] : memref<8x128xf32, #tpu.memory_space<vmem>>, vector<8x128xf32>
    tpu.vector_store %arg5[%c0_8, %c0_9], %10 {strides = array<i32>} : memref<8x128xf32, #tpu.memory_space<vmem>>, vector<8x128xf32>,
    %c0_i32_10 = arith.constant 0 : i32
    %12 = arith.cmpi eq, %arg1, %c0_i32_10 : i32
    %13 = arith.extui %12 : i1 to i32
    %c0_i32_11 = arith.constant 0 : i32
    %14 = arith.cmpi ne, %13, %c0_i32_11 : i32
    scf.if %14 {
      %c0_12 = arith.constant 0 : index
      %c0_13 = arith.constant 0 : index
      %15 = vector.load %arg5[%c0_12, %c0_13] : memref<8x128xf32, #tpu.memory_space<vmem>>, vector<8x128xf32>
      %16 = vector.shape_cast %15 : vector<8x128xf32> to vector<1x8x128xf32>
      %cst = arith.constant dense<0.000000e+00> : vector<1xf32>
      %17 = vector.multi_reduction <add>, %16, %cst [1, 2] : vector<1x8x128xf32> to vector<1xf32>
      %18 = vector.shape_cast %17 : vector<1xf32> to vector<1x1x1xf32>
      %19 = vector.extract %18[0, 0, 0] : f32 from vector<1x1x1xf32>
      %20 = vector.broadcast %19 : f32 to vector<1x1x1xf32>
      %c0_14 = arith.constant 0 : index
      %c0_15 = arith.constant 0 : index
      %c0_16 = arith.constant 0 : index
      %21 = vector.load %arg4[%c0_14, %c0_15, %c0_16] : memref<1x1x1xf32, #tpu.memory_space<vmem>>, vector<1x1x1xf32>
      tpu.vector_store %arg4[%c0_14, %c0_15, %c0_16], %20 {strides = array<i32>} : memref<1x1x1xf32, #tpu.memory_space<vmem>>, vector<1x1x1xf32>,
    } else {
    }
    return
  }
  func.func @transform_0(%arg0: i32, %arg1: i32) -> (i32, i32, i32) {
    %c0_i32 = arith.constant 0 : i32
    %c0_i32_0 = arith.constant 0 : i32
    return %arg0, %arg1, %c0_i32 : i32, i32, i32
  }
  func.func @transform_1(%arg0: i32, %arg1: i32) -> (i32, i32, i32) {
    %c0_i32 = arith.constant 0 : i32
    %c0_i32_0 = arith.constant 0 : i32
    return %arg0, %arg1, %c0_i32 : i32, i32, i32
  }
  func.func @transform_2(%arg0: i32, %arg1: i32) -> (i32, i32, i32) {
    %c0_i32 = arith.constant 0 : i32
    %c0_i32_0 = arith.constant 0 : i32
    %c0_i32_1 = arith.constant 0 : i32
    return %arg0, %c0_i32, %c0_i32_0 : i32, i32, i32
  }
}

</mosaic_0001>

<bundles_post_ra>
// kernel: tpu_custom_call.1
= control target key start
LH: loop header
LB: loop body
LE: loop exit
PB: predicated region body
PF: predicated region fallthrough
CT: control target
= control target key end

     0   :  { %7 = vsyncpa [#allocation4], 0  ;;  %s637_s0 = inlined_call_operand.hbm [shape: f32[2,8,128], index: 0, kind: input, shape index: {}]   ;;  %s638_s1 = inlined_call_operand.hbm [shape: f32[2,8,128], index: 1, kind: input, shape index: {}]   ;;  %s639_s2 = inlined_call_operand.vmem [shape: f32[2,1,1], index: 2, kind: output, shape index: {}]  }
   0x1   :  { %9 = vsyncpa [#allocation4 + $0x1], 0 }
   0x2   :  { %10 = vsyncpa [#allocation6], 0 }
   0x3   :  { %12 = vsyncpa [#allocation6 + $0x1], 0  ;;  %s542_s9 = smov 0   ;;  %s544_s10 = smov 0  }
   0x4   :  { %s546_s11 = smov 0   ;;  %s548_s12 = smov 0  }
   0x5   :  { %s550_s13 = smov 0   ;;  %s552_s14 = smov 0  }
   0x6 LB: > { %s336_s15 = sadd.s32 4294967295, %s525_s14   ;;  %s30_s16 = sadd.s32 1, %s521_s13  ;;  %s525_s14 = sphi %s552_s14, %s18_s14   ;;  %s521_s13 = sphi %s550_s13, %s646_s13   ;;  %s517_s12 = sphi %s548_s12, %s645_s12   ;;  %s513_s11 = sphi %s546_s11, %s644_s11   ;;  %s509_s10 = sphi %s544_s10, %s643_s10   ;;  %s505_s9 = sphi %s542_s9, %s642_s9  }
   0x7   : > { %p32_p0 = scmp.ge.s32.totalorder %s30_s16, 2  ;;  %s39_s17 = sadd.s32 1, %s513_s11 }
   0x8   : > { %p46_p1 = scmp.ne.s32.totalorder %s513_s11, %s509_s10  ;;  %p47_p2 = scmp.eq.s32.totalorder %s525_s14, 0 }
   0x9   : > { %s648_s16 = smov (%p32_p0, %s30_s16), 0  ;;  %p52_p4 = scmp.ne.s32.totalorder %s509_s10, %s505_s9 }
   0xa   : > { %p578_p3 = por %p47_p2, %p46_p1  ;;  %s34_s19 = ssub.s32 %s521_s13, %s648_s16 }
   0xb   : > { %p53_p5 = scmp.eq.s32.totalorder %s336_s15, 0  ;;  %p37_p6 = scmp.eq.s32.totalorder %s34_s19, 0 }
   0xc   : > { %p362_p8 = scmp.lt.s32.totalorder %s525_s14, 2  ;;  %s130_s22 = sand.u32 1, %s513_s11  }
   0xd   : > { %p585_p7 = por %p53_p5, %p52_p4  ;;  %s341_s23 = sshll.u32 %s521_s13, 3 }
   0xe   : > { %s591_s21 = scalar_select %p37_p6, %s513_s11, %s39_s17  }
   0xf   : > { %s340_s24 = sshll.u32 %s130_s22, 3  ;;  %s139_s27 = scalar_lea.hbm %s637_s0, %s341_s23 }
  0x10   : > { %s141_s28 = sshll.u32 %s139_s27, 4  ;;  %s134_s29 = scalar_lea.vmem [#allocation3], %s340_s24  ;;  %s142_s28 = int_to_ptr.hbm [resolvable:$true] %s141_s28 }
  0x11   : > { %s143_s30 = sshll.u32 %s134_s29, 4  ;;  %p356_p9 = pnand %p362_p8, %p578_p3  ;;  %s144_s30 = int_to_ptr.vmem [resolvable:$true] %s143_s30 }
  0x12   : > { %p344_p10 = scmp.ge.s32.totalorder %s525_s14, 1  ;;  %p168_p11 = scmp.lt.s32.totalorder %s525_s14, 3 }
  0x13   : > { %s131_s3 = scalar_lea.sflag [#allocation4], %s130_s22  ;;  %s159_s6 = scalar_lea.hbm %s638_s1, %s341_s23 }
  0x14   : > { %358 = dma.hbm_to_vmem [thread:$0]  (!%p356_p9), %s142_s28, 128, %s144_s30, %s131_s3  }
  0x15   : > { %p169_p12 = pnand %p344_p10, %p168_p11  ;;  %s161_s7 = sshll.u32 %s159_s6, 4  ;;  %s162_s7 = int_to_ptr.hbm [resolvable:$true] %s161_s7 }
  0x16   : > { %s154_s8 = scalar_lea.vmem [#allocation5], %s340_s24  ;;  %s151_s15 = scalar_lea.sflag [#allocation6], %s130_s22 }
  0x17   : > { %s163_s9 = sshll.u32 %s154_s8, 4  ;;  %172 = sbr.rel (%p169_p12) target bundleno = 216 (0xd8), region = 28  ;;  %s164_s9 = int_to_ptr.vmem [resolvable:$true] %s163_s9 }
  0x18   : > { %361 = dma.hbm_to_vmem [thread:$0]  (!%p356_p9), %s162_s7, 128, %s164_s9, %s151_s15  }
  0x19   : > { %s174_s17 = sand.u32 (!%p169_p12), 1, %s509_s10  }
  0x1a   : > { %s345_s18 = sshll.u32 (!%p169_p12), %s174_s17, 3  ;;  %s175_s19 = scalar_lea.sflag (!%p169_p12), [#allocation4], %s174_s17 }
  0x1b   : > { %s178_s25 = scalar_lea.vmem (!%p169_p12), [#allocation3], %s345_s18 }
  0x1c   : > { %496 = dma.done.wait (%p585_p7), %s175_s19, 128  }
  0x1d   : > { %498 = vsyncadd (%p585_p7), %s175_s19, 4294967168  ;;  %s185_s23 = scalar_lea.sflag [#allocation6], %s174_s17  ;;  %s188_s24 = scalar_lea.vmem [#allocation5], %s345_s18 }
  0x1e   : > { %500 = dma.done.wait (%p585_p7), %s185_s23, 128  }
  0x1f   : > { %502 = vsyncadd (%p585_p7), %s185_s23, 4294967168  ;;  %v221_v0 = vld [vmem:[%s178_s25] sm:$0xff]  ;;  %v222_v1 = vld [vmem:[%s188_s24] sm:$0xff]  ;;  %p213_p13 = scmp.lt.s32.totalorder %s517_s12, 1  ;;  %vm242_vm0 = vcmask 0  }
  0x20   : > { %v223_v2 = vsub.f32 %v221_v0, %v222_v1 }
  0x21   : > { %s650_s12 = smov (!%p213_p13, %s517_s12), 1 }
  0x22   : > { %v225_v3 = vmul.f32 %v223_v2, %v223_v2  ;;  %s215_s26 = scalar_lea.vmem %s639_s2, %s650_s12 }
  0x24   : > { %232 = vadd.xlane.f32.xlu0 %v225_v3 }
  0x97   : > { %v233_v4 = vpop.xlane.xlu0 %232 }
  0x98   : > { %v234_v5 = vrot.slane %v233_v4, 4 }
  0x9a   : > { %v235_v6 = vadd.f32 %v234_v5, %v233_v4 }
  0x9c   : > { %v236_v7 = vrot.slane %v235_v6, 2 }
  0x9e   : > { %v237_v8 = vadd.f32 %v236_v7, %v235_v6 }
  0xa0   : > { %v238_v9 = vrot.slane %v237_v8, 1 }
  0xa2   : > { %v239_v10 = vadd.f32 %v238_v9, %v237_v8 }
  0xa4   : > { %349 = vpush %v239_v10 }
  0xd5   : > { %s350_s27 = spop %349 }
  0xd6   : > { %v241_v11 = vstv %s350_s27 }
  0xd7   : > { %243 = vst.msk [vmem:[%s215_s26] sm:$0x1] %vm242_vm0, %v241_v11 }
  0xd8 PF: > { %s18_s14 = sadd.s32 1, %s525_s14   ;;  %s642_s9 = smov %s509_s10 }
  0xd9   : > { %p15_p0 = scmp.ge.s32.totalorder %s18_s14, 4   ;;  %s643_s10 = smov %s513_s11 }
  0xda   : > { %s644_s11 = smov %s591_s21  ;;  %s645_s12 = smov %s521_s13 }
  0xdb   : > { %s646_s13 = smov %s648_s16  ;;  %17 = sbr.rel (!%p15_p0) target bundleno = 6 (0x6), region = 89 }
  0xe0   :  { %261 = vsyncpa [#allocation4], 1 }
  0xe1   :  { %263 = vsyncpa [#allocation4 + $0x1], 1 }
  0xe2   :  { %264 = vsyncpa [#allocation6], 1 }
  0xe3   :  { %266 = vsyncpa [#allocation6 + $0x1], 1 }

</bundles_post_ra>
